<compile_context>
chip_gen: v7x
topology: tpu7x:2x2x1
jax: 0.10.0
libtpu: 0.0.40
codegen_flags: <defaults>
</compile_context>

<pallas_src>
import functools

import jax
import jax.numpy as jnp
from jax.experimental import pallas as pl
from jax.experimental.pallas import tpu as pltpu

_SUBLANE = 8


def _round_up(n, m):
    return ((n + m - 1) // m) * m


def _pick_batch_tile(batch, block_batch):
    """Multiple-of-8 batch tile.

    Aims for >=2 grid steps when the batch allows it (so v7x's two TensorCores
    both get work), and evens the tile size across steps so the ragged last
    block wastes fewer than 8 rows of DMA/compute.
    """
    if batch <= _SUBLANE:
        return batch  # single tile; block == full array dim is legal
    tb = min(block_batch, _round_up(pl.cdiv(batch, 2), _SUBLANE))
    tb = max(_SUBLANE, (tb // _SUBLANE) * _SUBLANE)
    steps = pl.cdiv(batch, tb)
    return _round_up(pl.cdiv(batch, steps), _SUBLANE)


def ffnn_kernel(x_ref, w1_ref, b1_ref, w2_ref, b2_ref, w3_ref, b3_ref, o_ref):
    # x streamed from HBM unpadded; any compute-dtype cast happens here on the
    # VPU (never re-materialized in the wrapper).
    x = x_ref[...].astype(w1_ref.dtype)                       # (TB, D_in)

    # fc1 + ReLU  (MXU matmul, f32 accumulation; bias + ReLU on VPU in f32)
    h1 = jnp.dot(x, w1_ref[...], preferred_element_type=jnp.float32)
    h1 = jnp.maximum(h1 + b1_ref[...], 0.0)                   # (TB, H1) f32

    # fc2 + ReLU
    h2 = jnp.dot(h1.astype(w2_ref.dtype), w2_ref[...],
                 preferred_element_type=jnp.float32)
    h2 = jnp.maximum(h2 + b2_ref[...], 0.0)                   # (TB, H2) f32

    # dropout(p=0.3): identity in inference mode.
    # TODO(synk): training-mode dropout (Bernoulli mask via pltpu.prng_*) not emitted.

    # fc3 (output kept at its true width -> minimal HBM writeback)
    out = jnp.dot(h2.astype(w3_ref.dtype), w3_ref[...],
                  preferred_element_type=jnp.float32)
    o_ref[...] = (out + b3_ref[...]).astype(o_ref.dtype)      # (TB, D_out)


@functools.partial(jax.jit, static_argnames=("block_batch", "compute_dtype"))
def ffnn_forward(x, params, *, block_batch=2048, compute_dtype=None):
    """Fused MLP forward.

    x: (B, D_in) float32.
    params: dict of (in, out)-layout weights w1/w2/w3 and (1, out) biases.
    compute_dtype: dtype fed to the MXU (f32 default; bf16 optional).
    """
    w1, b1, w2, b2, w3, b3 = (params["w1"], params["b1"], params["w2"],
                              params["b2"], params["w3"], params["b3"])
    B, D_in = x.shape
    H1, H2, D_out = w1.shape[1], w2.shape[1], w3.shape[1]

    if compute_dtype is not None:
        # Weights are tiny (a few KiB) -- casting them here is negligible; x is
        # cast in-kernel so there is no extra HBM pass over the activations.
        w1, w2, w3 = (w.astype(compute_dtype) for w in (w1, w2, w3))
    # Biases stay f32: added to the f32 MXU accumulator on the VPU.
    b1, b2, b3 = (b.astype(jnp.float32) for b in (b1, b2, b3))

    TB = _pick_batch_tile(B, block_batch)
    grid = (pl.cdiv(B, TB),)   # ragged last tile handled by Pallas boundary masking

    resident = lambda shape: pl.BlockSpec(shape, lambda i: (0, 0))  # DMA'd once

    flops = 2 * B * (D_in * H1 + H1 * H2 + H2 * D_out)
    bytes_accessed = 4 * (B * (D_in + D_out)
                          + D_in * H1 + H1 * H2 + H2 * D_out + H1 + H2 + D_out)

    return pl.pallas_call(
        ffnn_kernel,
        out_shape=jax.ShapeDtypeStruct((B, D_out), jnp.float32),
        grid=grid,
        in_specs=[
            pl.BlockSpec((TB, D_in), lambda i: (i, 0)),   # x: streamed, unpadded
            resident((D_in, H1)),                         # w1 (VMEM-resident)
            resident((1, H1)),                            # b1
            resident((H1, H2)),                           # w2
            resident((1, H2)),                            # b2
            resident((H2, D_out)),                        # w3
            resident((1, D_out)),                         # b3
        ],
        out_specs=pl.BlockSpec((TB, D_out), lambda i: (i, 0)),
        compiler_params=pltpu.CompilerParams(
            dimension_semantics=("parallel",),            # v7x dual-TC sharding
        ),
        cost_estimate=pl.CostEstimate(
            flops=flops, transcendentals=0, bytes_accessed=bytes_accessed),
    )(x, w1, b1, w2, b2, w3, b3)


def init_params(key, input_dim, hidden_dim=32, output_dim=1, dtype=jnp.float32):
    """Deterministic init mirroring nn.Linear shapes (weights stored transposed: (in, out))."""
    ks = jax.random.split(key, 6)

    def linear(kw, kb, fan_in, fan_out):
        bound = 1.0 / jnp.sqrt(fan_in)
        w = jax.random.uniform(kw, (fan_in, fan_out), dtype, -bound, bound)
        b = jax.random.uniform(kb, (1, fan_out), dtype, -bound, bound)
        return w, b

    w1, b1 = linear(ks[0], ks[1], input_dim, hidden_dim)
    w2, b2 = linear(ks[2], ks[3], hidden_dim, hidden_dim)
    w3, b3 = linear(ks[4], ks[5], hidden_dim, output_dim)
    return dict(w1=w1, b1=b1, w2=w2, b2=b2, w3=w3, b3=b3)


def ffnn_reference(x, p):
    h1 = jnp.maximum(x @ p["w1"] + p["b1"], 0.0)
    h2 = jnp.maximum(h1 @ p["w2"] + p["b2"], 0.0)
    return h2 @ p["w3"] + p["b3"]


if __name__ == "__main__":
    key = jax.random.PRNGKey(0)
    k_x, k_x2, k_p = jax.random.split(key, 3)

    batch, input_dim, hidden_dim, output_dim = 8, 16, 32, 1
    x = jax.random.normal(k_x, (batch, input_dim), dtype=jnp.float32)
    params = init_params(k_p, input_dim, hidden_dim, output_dim)

    # f32 path, single-tile grid (batch fits in one 8-row tile).
    out = jax.block_until_ready(ffnn_forward(x, params))
    ref = ffnn_reference(x, params)
    assert out.shape == (batch, output_dim), out.shape
    assert jnp.allclose(out, ref, atol=1e-5, rtol=1e-5), "f32 mismatch vs reference"

    # Multi-step grid with a ragged last tile (batch not a multiple of the tile),
    # f32 path, tight tolerance.
    batch2 = 300
    x2 = jax.random.normal(k_x2, (batch2, input_dim), dtype=jnp.float32)
    out2 = jax.block_until_ready(ffnn_forward(x2, params, block_batch=128))
    ref2 = ffnn_reference(x2, params)
    assert out2.shape == (batch2, output_dim), out2.shape
    assert jnp.allclose(out2, ref2, atol=1e-5, rtol=1e-5), "f32 multi-tile mismatch"

    # Optional bf16 MXU operands (cast of x happens in-kernel), loose tolerance.
    out3 = jax.block_until_ready(
        ffnn_forward(x2, params, block_batch=128, compute_dtype=jnp.bfloat16))
    assert out3.shape == (batch2, output_dim), out3.shape
    assert jnp.allclose(out3, ref2, atol=5e-2, rtol=5e-2), "bf16 mismatch vs reference"

    print("KERNEL_OK")
</pallas_src>

<mosaic_0001>
module attributes {stable_mosaic.version = 11 : i64} {
  func.func @ffnn_kernel(%arg0: i32, %arg1: memref<8x16xf32, #tpu.memory_space<vmem>>, %arg2: memref<16x32xf32, #tpu.memory_space<vmem>>, %arg3: memref<1x32xf32, #tpu.memory_space<vmem>>, %arg4: memref<32x32xf32, #tpu.memory_space<vmem>>, %arg5: memref<1x32xf32, #tpu.memory_space<vmem>>, %arg6: memref<32x1xf32, #tpu.memory_space<vmem>>, %arg7: memref<1x1xf32, #tpu.memory_space<vmem>>, %arg8: memref<8x1xf32, #tpu.memory_space<vmem>>) attributes {dimension_semantics = [#tpu.dimension_semantics<parallel>], iteration_bounds = array<i64: 1>, scalar_prefetch = 0 : i64, scratch_operands = 0 : i64, tpu.core_type = #tpu.core_type<tc>, window_params = [{transform_indices = @transform_0, window_bounds = array<i64: 8, 16>}, {pipeline_mode = #tpu.pipeline_mode<synchronous>, transform_indices = @transform_1, window_bounds = array<i64: 16, 32>}, {pipeline_mode = #tpu.pipeline_mode<synchronous>, transform_indices = @transform_2, window_bounds = array<i64: 1, 32>}, {pipeline_mode = #tpu.pipeline_mode<synchronous>, transform_indices = @transform_3, window_bounds = array<i64: 32, 32>}, {pipeline_mode = #tpu.pipeline_mode<synchronous>, transform_indices = @transform_4, window_bounds = array<i64: 1, 32>}, {pipeline_mode = #tpu.pipeline_mode<synchronous>, transform_indices = @transform_5, window_bounds = array<i64: 32, 1>}, {pipeline_mode = #tpu.pipeline_mode<synchronous>, transform_indices = @transform_6, window_bounds = array<i64: 1, 1>}, {transform_indices = @transform_7, window_bounds = array<i64: 8, 1>}]} {
    %c0 = arith.constant 0 : index
    %c0_0 = arith.constant 0 : index
    %0 = vector.load %arg1[%c0, %c0_0] : memref<8x16xf32, #tpu.memory_space<vmem>>, vector<8x16xf32>
    %c0_1 = arith.constant 0 : index
    %c0_2 = arith.constant 0 : index
    %1 = vector.load %arg2[%c0_1, %c0_2] : memref<16x32xf32, #tpu.memory_space<vmem>>, vector<16x32xf32>
    %cst = arith.constant dense<0.000000e+00> : vector<8x32xf32>
    %2 = tpu.matmul %0, %1, %cst {dimension_numbers = #tpu.dot_dimension_numbers<[1], [0], [0], [1], [0, 0, 1, 1], [], []>} : vector<8x16xf32>, vector<16x32xf32>, vector<8x32xf32> -> vector<8x32xf32>
    %c0_3 = arith.constant 0 : index
    %c0_4 = arith.constant 0 : index
    %3 = vector.load %arg3[%c0_3, %c0_4] : memref<1x32xf32, #tpu.memory_space<vmem>>, vector<1x32xf32>
    %4 = vector.broadcast %3 : vector<1x32xf32> to vector<8x32xf32>
    %5 = arith.addf %2, %4 : vector<8x32xf32>
    %cst_5 = arith.constant 0.000000e+00 : f32
    %6 = vector.broadcast %cst_5 : f32 to vector<8x32xf32>
    %7 = arith.maximumf %5, %6 : vector<8x32xf32>
    %c0_6 = arith.constant 0 : index
    %c0_7 = arith.constant 0 : index
    %8 = vector.load %arg4[%c0_6, %c0_7] : memref<32x32xf32, #tpu.memory_space<vmem>>, vector<32x32xf32>
    %cst_8 = arith.constant dense<0.000000e+00> : vector<8x32xf32>
    %9 = tpu.matmul %7, %8, %cst_8 {dimension_numbers = #tpu.dot_dimension_numbers<[1], [0], [0], [1], [0, 0, 1, 1], [], []>} : vector<8x32xf32>, vector<32x32xf32>, vector<8x32xf32> -> vector<8x32xf32>
    %c0_9 = arith.constant 0 : index
    %c0_10 = arith.constant 0 : index
    %10 = vector.load %arg5[%c0_9, %c0_10] : memref<1x32xf32, #tpu.memory_space<vmem>>, vector<1x32xf32>
    %11 = vector.broadcast %10 : vector<1x32xf32> to vector<8x32xf32>
    %12 = arith.addf %9, %11 : vector<8x32xf32>
    %cst_11 = arith.constant 0.000000e+00 : f32
    %13 = vector.broadcast %cst_11 : f32 to vector<8x32xf32>
    %14 = arith.maximumf %12, %13 : vector<8x32xf32>
    %c0_12 = arith.constant 0 : index
    %c0_13 = arith.constant 0 : index
    %15 = vector.load %arg6[%c0_12, %c0_13] : memref<32x1xf32, #tpu.memory_space<vmem>>, vector<32x1xf32>
    %cst_14 = arith.constant dense<0.000000e+00> : vector<8x1xf32>
    %16 = tpu.matmul %14, %15, %cst_14 {dimension_numbers = #tpu.dot_dimension_numbers<[1], [0], [0], [1], [0, 0, 1, 1], [], []>} : vector<8x32xf32>, vector<32x1xf32>, vector<8x1xf32> -> vector<8x1xf32>
    %c0_15 = arith.constant 0 : index
    %c0_16 = arith.constant 0 : index
    %17 = vector.load %arg7[%c0_15, %c0_16] : memref<1x1xf32, #tpu.memory_space<vmem>>, vector<1x1xf32>
    %18 = vector.broadcast %17 : vector<1x1xf32> to vector<8x1xf32>
    %19 = arith.addf %16, %18 : vector<8x1xf32>
    %c0_17 = arith.constant 0 : index
    %c0_18 = arith.constant 0 : index
    %20 = vector.load %arg8[%c0_17, %c0_18] : memref<8x1xf32, #tpu.memory_space<vmem>>, vector<8x1xf32>
    tpu.vector_store %arg8[%c0_17, %c0_18], %19 {strides = array<i32>} : memref<8x1xf32, #tpu.memory_space<vmem>>, vector<8x1xf32>,
    return
  }
  func.func @transform_0(%arg0: i32) -> (i32, i32) {
    %c0_i32 = arith.constant 0 : i32
    %c0_i32_0 = arith.constant 0 : i32
    return %arg0, %c0_i32 : i32, i32
  }
  func.func @transform_1(%arg0: i32) -> (i32, i32) {
    %c0_i32 = arith.constant 0 : i32
    %c0_i32_0 = arith.constant 0 : i32
    %c0_i32_1 = arith.constant 0 : i32
    return %c0_i32, %c0_i32_0 : i32, i32
  }
  func.func @transform_2(%arg0: i32) -> (i32, i32) {
    %c0_i32 = arith.constant 0 : i32
    %c0_i32_0 = arith.constant 0 : i32
    %c0_i32_1 = arith.constant 0 : i32
    return %c0_i32, %c0_i32_0 : i32, i32
  }
  func.func @transform_3(%arg0: i32) -> (i32, i32) {
    %c0_i32 = arith.constant 0 : i32
    %c0_i32_0 = arith.constant 0 : i32
    %c0_i32_1 = arith.constant 0 : i32
    return %c0_i32, %c0_i32_0 : i32, i32
  }
  func.func @transform_4(%arg0: i32) -> (i32, i32) {
    %c0_i32 = arith.constant 0 : i32
    %c0_i32_0 = arith.constant 0 : i32
    %c0_i32_1 = arith.constant 0 : i32
    return %c0_i32, %c0_i32_0 : i32, i32
  }
  func.func @transform_5(%arg0: i32) -> (i32, i32) {
    %c0_i32 = arith.constant 0 : i32
    %c0_i32_0 = arith.constant 0 : i32
    %c0_i32_1 = arith.constant 0 : i32
    return %c0_i32, %c0_i32_0 : i32, i32
  }
  func.func @transform_6(%arg0: i32) -> (i32, i32) {
    %c0_i32 = arith.constant 0 : i32
    %c0_i32_0 = arith.constant 0 : i32
    %c0_i32_1 = arith.constant 0 : i32
    return %c0_i32, %c0_i32_0 : i32, i32
  }
  func.func @transform_7(%arg0: i32) -> (i32, i32) {
    %c0_i32 = arith.constant 0 : i32
    %c0_i32_0 = arith.constant 0 : i32
    return %arg0, %c0_i32 : i32, i32
  }
}

</mosaic_0001>

<bundles_post_ra>
// kernel: ffnn_forward.1
= control target key start
LH: loop header
LB: loop body
LE: loop exit
PB: predicated region body
PF: predicated region fallthrough
CT: control target
= control target key end

     0   :  { %s494_s0 = inlined_call_operand.hbm [shape: f32[8,16], index: 0, kind: input, shape index: {}]   ;;  %s495_s1 = inlined_call_operand.vmem [shape: f32[16,32], index: 1, kind: input, shape index: {}]   ;;  %s496_s2 = inlined_call_operand.vmem [shape: f32[1,32], index: 2, kind: input, shape index: {}]   ;;  %s497_s3 = inlined_call_operand.vmem [shape: f32[32,32], index: 3, kind: input, shape index: {}]   ;;  %s498_s4 = inlined_call_operand.vmem [shape: f32[1,32], index: 4, kind: input, shape index: {}]   ;;  %s499_s5 = inlined_call_operand.vmem [shape: f32[32,1], index: 5, kind: input, shape index: {}]   ;;  %s500_s6 = inlined_call_operand.<no memory space> [shape: f32[1,1], index: 6, kind: input, shape index: {}]   ;;  %s501_s7 = inlined_call_operand.vmem [shape: f32[8,1], index: 7, kind: output, shape index: {}]  }
   0x1   :  { %v12_v0 = vstv %s500_s6 }
   0x2   :  { %13 = vst [vmem:[#allocation2] sm:$0x1] %v12_v0 }
   0x3   :  { %14 = vsyncpa [#allocation4], 0  ;;  %s393_s26 = smov [#allocation3]   ;;  %s369_s30 = scalar_lea.hbm %s494_s0, 128 }
   0x4   :  { %s21_s27 = sshll.u32 %s393_s26, 4  ;;  %p370_p0 = scmp.ne.s32.totalorder %s494_s0, %s369_s30  ;;  %s22_s27 = int_to_ptr.vmem [resolvable:$true] %s21_s27 }
   0x5   :  { %p373_p1 = scmp.lt.u32.totalorder %s369_s30, %s494_s0 }
   0x7   :  { %p375_p2 = pnand %p373_p1, %p370_p0 }
   0x9   :  { %378 = shalt.err (!%p375_p2)
}
   0xa   :  { %s379_s6 = scalar_lea.vmem %s22_s27, 128  ;;  %p384_p4 = scmp.lt.s32.totalorder %s22_s27, %s22_s27 }
   0xb   :  { %p380_p3 = scmp.ne.s32.totalorder %s22_s27, %s379_s6  ;;  %p385_p5 = scmp.lt.s32.totalorder %s379_s6, %s379_s6 }
   0xd   :  { %p386_p6 = por %p385_p5, %p384_p4 }
   0xf   :  { %p387_p7 = pnand %p386_p6, %p380_p3 }
  0x11   :  { %390 = shalt.err (!%p387_p7)
}
  0x12   :  { %24 = dma.hbm_to_vmem [thread:$0]  %s494_s0, 128, %s22_s27, [#allocation4]  }
  0x13   :  { %391 = dma.done.wait [#allocation4], 128  }
  0x14   :  { %392 = vsyncadd [#allocation4], 4294967168  ;;  %v394_v1 = vmov 0.0|0.0   ;;  %vm395_vm0 = vmmov 0   ;;  %v396_v2 = vmov 0.0   ;;  %v41_v3 = vld [vmem:[%s495_s1] sm:$0xff] }
  0x15   :  { %350 = vmatprep.subr.bf16.mxu0 %v394_v1  ;;  %325 = vmatprep.mubr.msk.f32.mxu0 %vm395_vm0, %v396_v2  ;;  %v42_v4 = vld [vmem:[%s495_s1 + $0x8] sm:$0xff]  ;;  %v125_v6 = vld [vmem:[%s497_s3] sm:$0xff]  ;;  %vm50_vm1 = vcmask 130048   ;;  %v127_v10 = vld [vmem:[%s497_s3 + $0x10] sm:$0xff]  ;;  %vm136_vm2 = vcmask 261120   ;;  %vm295_vm3 = vcmask 7168  }
  0x16   :  { %353 = vmatprep.subr.bf16.mxu1 %v394_v1  ;;  %336 = vmatprep.mubr.msk.f32.mxu1 %vm395_vm0, %v396_v2  ;;  %v351_v5 = vpack.c.bf16 %v42_v4, %v41_v3  ;;  %v126_v7 = vld [vmem:[%s497_s3 + $0x8] sm:$0xff]  ;;  %v128_v11 = vld [vmem:[%s497_s3 + $0x18] sm:$0xff]  ;;  %v211_v13 = vld [vmem:[%s499_s5] sm:$0xff] }
  0x17   :  { %v354_v8 = vpack.c.bf16 %v126_v7, %v125_v6  ;;  %v40_v9 = vld [vmem:[#allocation3] sm:$0xff]  ;;  %v357_v12 = vpack.c.bf16 %v128_v11, %v127_v10  ;;  %v302_v16 = vld [vmem:[%s496_s2] ss:$0 sm:$0xff]  ;;  %v213_v21 = vld [vmem:[%s499_s5 + $0x10] sm:$0xff] }
  0x18   :  { %352 = vmatpush3.bf16.msra.mxu0 %v351_v5  ;;  %v212_v14 = vld [vmem:[%s499_s5 + $0x8] sm:$0xff]  ;;  %v214_v22 = vld [vmem:[%s499_s5 + $0x18] sm:$0xff]  ;;  %v304_v24 = vld [vmem:[%s498_s4] ss:$0 sm:$0xff] }
  0x19   :  { %355 = vmatpush3.bf16.msra.mxu1 %v354_v8  ;;  %359 = vmatprep.subr.bf16.mxu0 %v394_v1  ;;  %v360_v15 = vpack.c.bf16 %v212_v14, %v211_v13  ;;  %v363_v23 = vpack.c.bf16 %v214_v22, %v213_v21  ;;  %v306_v29 = vld [vmem:[#allocation2] ss:$0 sm:$0xff] }
  0x1a   :  { %356 = vmatprep.subr.bf16.mxu1 %v394_v1 }
  0x1b   :  { %326 = vmatmul.mubr.msk.f32.vlgmr.msra.gmra.mrb[0].mxu0 %vm50_vm1, %v40_v9 }
  0x1c   :  { %347 = vmatprep.mubr.msk.f32.mxu0 %vm395_vm0, %v396_v2  ;;  %361 = vmatpush3.bf16.msra.mxu0 %v360_v15 }
  0x1d   :  { %358 = vmatpush3.bf16.msra.mxu1 %v357_v12  ;;  %362 = vmatprep.subr.bf16.mxu0 %v394_v1 }
  0x20   :  { %364 = vmatpush3.bf16.msra.mxu0 %v363_v23 }
  0xee   :  { %v120_v17 = vpop.f32.mrb[0].mxu0 }
  0xef   :  { %v121_v18 = vadd.f32 %v302_v16, %v120_v17  ;;  %v327_v19 = vpop.f32.mrb[1].mxu0 }
  0xf1   :  { %v124_v20 = vmax.f32 %v121_v18, 0.0 }
  0xf3   :  { %337 = vmatmul.mubr.msk.f32.vlgmr.msra.gmra.mrb[0].mxu1 %vm136_vm2, %v124_v20 }
 0x1c6   :  { %v206_v25 = vpop.f32.mrb[0].mxu1 }
 0x1c7   :  { %v207_v26 = vadd.f32 %v304_v24, %v206_v25  ;;  %v338_v27 = vpop.f32.mrb[1].mxu1 }
 0x1c9   :  { %v210_v28 = vmax.f32 %v207_v26, 0.0 }
 0x1cb   :  { %348 = vmatmul.mubr.msk.f32.vlgmr.msra.gmra.mrb[2].mxu0 %vm136_vm2, %v210_v28 }
 0x29e   :  { %v291_v30 = vpop.f32.mrb[2].mxu0 }
 0x29f   :  { %v292_v31 = vadd.f32 %v306_v29, %v291_v30  ;;  %v349_v32 = vpop.f32.mrb[3].mxu0 }
 0x2a1   :  { %296 = vst.msk [vmem:[%s501_s7] sm:$0xff] %vm295_vm3, %v292_v31 }
 0x2a2   :  { %301 = vsyncpa [#allocation4], 1 }

</bundles_post_ra>
